<compile_context>
chip_gen: v7x
topology: tpu7x:2x2x1
jax: 0.10.0
libtpu: 0.0.40
codegen_flags: <defaults>
</compile_context>

<pallas_src>
import jax
import jax.numpy as jnp
from jax.experimental import pallas as pl
from jax.experimental.pallas import tpu as pltpu


def _round_up(x, m):
    return ((x + m - 1) // m) * m


def _qnet_kernel(x_ref, w1_ref, b1_ref, w2_ref, b2_ref, w3_ref, b3_ref, o_ref):
    """relu(x@W1+b1) -> relu(.@W2+b2) -> .@W3+b3 for one batch tile.

    MXU dots run in the storage dtype (bf16-native when weights are bf16) with f32
    accumulation; bias add / ReLU stay in f32 (v5e has no bf16 VPU paths).
    """
    x = x_ref[...]
    h = jnp.dot(x, w1_ref[...], preferred_element_type=jnp.float32)
    h = jnp.maximum(h + b1_ref[...].astype(jnp.float32), 0.0)
    h = jnp.dot(h.astype(w2_ref.dtype), w2_ref[...], preferred_element_type=jnp.float32)
    h = jnp.maximum(h + b2_ref[...].astype(jnp.float32), 0.0)
    q = jnp.dot(h.astype(w3_ref.dtype), w3_ref[...], preferred_element_type=jnp.float32)
    q = q + b3_ref[...].astype(jnp.float32)
    o_ref[...] = q.astype(o_ref.dtype)  # unpadded (tb, action_dim) store


def qnetwork_forward(state, params, *, batch_tile=1024):
    """state: (B, state_dim). params: (in,out) weights + (1,out) biases (biases f32)."""
    w1, b1 = params["w1"], params["b1"]
    w2, b2 = params["w2"], params["b2"]
    w3, b3 = params["w3"], params["b3"]

    B, state_dim = state.shape
    hidden = w1.shape[1]
    action_dim = w3.shape[1]
    out_dtype = state.dtype

    # Sublane granularity: 8 rows for 32-bit storage, 16 for bf16 sublane packing.
    sub = 8 if jnp.dtype(state.dtype).itemsize >= 4 else 16

    # Batch tile: always a multiple of the sublane granularity, capped by batch_tile/B.
    tb = _round_up(max(1, min(batch_tile, B)), sub)
    # v7x has 2 TensorCores: keep >= 2 grid steps on large batches so the
    # "parallel" batch axis actually lands work on both cores.
    if B > 256:
        tb = min(tb, _round_up(pl.cdiv(B, 2), sub))

    grid = (pl.cdiv(B, tb),)  # ragged last block handled by Pallas; no pad / no slice

    itemsize_in = jnp.dtype(state.dtype).itemsize
    itemsize_out = jnp.dtype(out_dtype).itemsize
    param_bytes = sum(
        int(a.size) * jnp.dtype(a.dtype).itemsize for a in (w1, b1, w2, b2, w3, b3)
    )
    cost = pl.CostEstimate(
        flops=2 * B * (state_dim * hidden + hidden * hidden + hidden * action_dim),
        transcendentals=0,
        bytes_accessed=B * state_dim * itemsize_in
        + B * action_dim * itemsize_out
        + param_bytes,
    )

    return pl.pallas_call(
        _qnet_kernel,
        out_shape=jax.ShapeDtypeStruct((B, action_dim), out_dtype),
        grid=grid,
        in_specs=[
            # batch-tiled state: new tile each grid step (software-pipelined DMA)
            pl.BlockSpec((tb, state_dim), lambda i: (i, 0)),
            # parameters: constant block index -> DMA'd once, resident across steps
            pl.BlockSpec((state_dim, hidden), lambda i: (0, 0)),
            pl.BlockSpec((1, hidden), lambda i: (0, 0)),
            pl.BlockSpec((hidden, hidden), lambda i: (0, 0)),
            pl.BlockSpec((1, hidden), lambda i: (0, 0)),
            pl.BlockSpec((hidden, action_dim), lambda i: (0, 0)),
            pl.BlockSpec((1, action_dim), lambda i: (0, 0)),
        ],
        out_specs=pl.BlockSpec((tb, action_dim), lambda i: (i, 0)),
        compiler_params=pltpu.CompilerParams(dimension_semantics=("parallel",)),
        cost_estimate=cost,
    )(state, w1, b1, w2, b2, w3, b3)


def init_qnetwork_params(key, state_dim, action_dim, hidden=64, dtype=jnp.float32):
    """Deterministic init mimicking nn.Linear default U[-1/sqrt(fan_in), 1/sqrt(fan_in)].

    Weights are stored as (in, out) = transpose of PyTorch's (out, in). Weight storage
    dtype is configurable (e.g. bf16); biases are kept f32 (tiny, f32 math in-kernel).
    """
    def linear(k, fan_in, fan_out):
        kw, kb = jax.random.split(k)
        bound = 1.0 / jnp.sqrt(jnp.float32(fan_in))
        w = jax.random.uniform(kw, (fan_in, fan_out), jnp.float32, -bound, bound)
        b = jax.random.uniform(kb, (1, fan_out), jnp.float32, -bound, bound)
        return w.astype(dtype), b

    k1, k2, k3 = jax.random.split(key, 3)
    w1, b1 = linear(k1, state_dim, hidden)
    w2, b2 = linear(k2, hidden, hidden)
    w3, b3 = linear(k3, hidden, action_dim)
    return {"w1": w1, "b1": b1, "w2": w2, "b2": b2, "w3": w3, "b3": b3}


def cast_params_storage(params, dtype):
    """One-time (hoisted out of the forward) cast of weight storage, e.g. to bfloat16."""
    out = dict(params)
    for k in ("w1", "w2", "w3"):
        out[k] = params[k].astype(dtype)
    return out


def qnetwork_reference(state, params):
    """Pure-JAX reference with the same mixed-precision contract as the kernel."""
    hp = jax.lax.Precision.HIGHEST
    h = jnp.dot(state, params["w1"], precision=hp, preferred_element_type=jnp.float32)
    h = jnp.maximum(h + params["b1"].astype(jnp.float32), 0.0)
    h = jnp.dot(h.astype(params["w2"].dtype), params["w2"], precision=hp,
                preferred_element_type=jnp.float32)
    h = jnp.maximum(h + params["b2"].astype(jnp.float32), 0.0)
    q = jnp.dot(h.astype(params["w3"].dtype), params["w3"], precision=hp,
                preferred_element_type=jnp.float32)
    return q + params["b3"].astype(jnp.float32)


if __name__ == "__main__":
    STATE_DIM, ACTION_DIM = 16, 8

    key = jax.random.PRNGKey(0)
    k_params, k_s1, k_s2, k_s3 = jax.random.split(key, 4)
    params = init_qnetwork_params(k_params, STATE_DIM, ACTION_DIM)

    # 1) Small acting-step batch (single grid step, tb rounded to sublane).
    B = 8
    s = jax.random.normal(k_s1, (B, STATE_DIM), jnp.float32)
    q = jax.block_until_ready(qnetwork_forward(s, params))
    assert q.shape == (B, ACTION_DIM)
    assert jnp.allclose(q, qnetwork_reference(s, params), atol=1e-4, rtol=1e-4), \
        "mismatch vs reference (B=8, f32)"

    # 2) Ragged training batch: multi-step grid + partial last block, no wrapper pad/slice.
    B2 = 300
    s2 = jax.random.normal(k_s2, (B2, STATE_DIM), jnp.float32)
    q2 = jax.block_until_ready(qnetwork_forward(s2, params, batch_tile=128))
    assert q2.shape == (B2, ACTION_DIM)
    assert jnp.allclose(q2, qnetwork_reference(s2, params), atol=1e-4, rtol=1e-4), \
        "mismatch vs reference (B=300, f32)"

    # 3) bf16 storage path (v6e/v5e HBM-traffic saving): bf16 state/weights/output,
    #    f32 MXU accumulation and f32 bias/ReLU math in-kernel.
    params_bf16 = cast_params_storage(params, jnp.bfloat16)
    B3 = 300
    s3 = jax.random.normal(k_s3, (B3, STATE_DIM), jnp.float32).astype(jnp.bfloat16)
    q3 = jax.block_until_ready(qnetwork_forward(s3, params_bf16, batch_tile=256))
    assert q3.shape == (B3, ACTION_DIM)
    ref3 = qnetwork_reference(s3, params_bf16)
    assert jnp.allclose(q3.astype(jnp.float32), ref3, atol=2e-2, rtol=2e-2), \
        "mismatch vs reference (B=300, bf16 storage)"

    print("KERNEL_OK")
</pallas_src>

<mosaic_0001>
module attributes {stable_mosaic.version = 11 : i64} {
  func.func @_qnet_kernel(%arg0: i32, %arg1: memref<8x16xf32, #tpu.memory_space<vmem>>, %arg2: memref<16x64xf32, #tpu.memory_space<vmem>>, %arg3: memref<1x64xf32, #tpu.memory_space<vmem>>, %arg4: memref<64x64xf32, #tpu.memory_space<vmem>>, %arg5: memref<1x64xf32, #tpu.memory_space<vmem>>, %arg6: memref<64x8xf32, #tpu.memory_space<vmem>>, %arg7: memref<1x8xf32, #tpu.memory_space<vmem>>, %arg8: memref<8x8xf32, #tpu.memory_space<vmem>>) attributes {dimension_semantics = [#tpu.dimension_semantics<parallel>], iteration_bounds = array<i64: 1>, scalar_prefetch = 0 : i64, scratch_operands = 0 : i64, tpu.core_type = #tpu.core_type<tc>, window_params = [{transform_indices = @transform_0, window_bounds = array<i64: 8, 16>}, {pipeline_mode = #tpu.pipeline_mode<synchronous>, transform_indices = @transform_1, window_bounds = array<i64: 16, 64>}, {pipeline_mode = #tpu.pipeline_mode<synchronous>, transform_indices = @transform_2, window_bounds = array<i64: 1, 64>}, {pipeline_mode = #tpu.pipeline_mode<synchronous>, transform_indices = @transform_3, window_bounds = array<i64: 64, 64>}, {pipeline_mode = #tpu.pipeline_mode<synchronous>, transform_indices = @transform_4, window_bounds = array<i64: 1, 64>}, {pipeline_mode = #tpu.pipeline_mode<synchronous>, transform_indices = @transform_5, window_bounds = array<i64: 64, 8>}, {pipeline_mode = #tpu.pipeline_mode<synchronous>, transform_indices = @transform_6, window_bounds = array<i64: 1, 8>}, {transform_indices = @transform_7, window_bounds = array<i64: 8, 8>}]} {
    %c0 = arith.constant 0 : index
    %c0_0 = arith.constant 0 : index
    %0 = vector.load %arg1[%c0, %c0_0] : memref<8x16xf32, #tpu.memory_space<vmem>>, vector<8x16xf32>
    %c0_1 = arith.constant 0 : index
    %c0_2 = arith.constant 0 : index
    %1 = vector.load %arg2[%c0_1, %c0_2] : memref<16x64xf32, #tpu.memory_space<vmem>>, vector<16x64xf32>
    %cst = arith.constant dense<0.000000e+00> : vector<8x64xf32>
    %2 = tpu.matmul %0, %1, %cst {dimension_numbers = #tpu.dot_dimension_numbers<[1], [0], [0], [1], [0, 0, 1, 1], [], []>} : vector<8x16xf32>, vector<16x64xf32>, vector<8x64xf32> -> vector<8x64xf32>
    %c0_3 = arith.constant 0 : index
    %c0_4 = arith.constant 0 : index
    %3 = vector.load %arg3[%c0_3, %c0_4] : memref<1x64xf32, #tpu.memory_space<vmem>>, vector<1x64xf32>
    %4 = vector.broadcast %3 : vector<1x64xf32> to vector<8x64xf32>
    %5 = arith.addf %2, %4 : vector<8x64xf32>
    %cst_5 = arith.constant 0.000000e+00 : f32
    %6 = vector.broadcast %cst_5 : f32 to vector<8x64xf32>
    %7 = arith.maximumf %5, %6 : vector<8x64xf32>
    %c0_6 = arith.constant 0 : index
    %c0_7 = arith.constant 0 : index
    %8 = vector.load %arg4[%c0_6, %c0_7] : memref<64x64xf32, #tpu.memory_space<vmem>>, vector<64x64xf32>
    %cst_8 = arith.constant dense<0.000000e+00> : vector<8x64xf32>
    %9 = tpu.matmul %7, %8, %cst_8 {dimension_numbers = #tpu.dot_dimension_numbers<[1], [0], [0], [1], [0, 0, 1, 1], [], []>} : vector<8x64xf32>, vector<64x64xf32>, vector<8x64xf32> -> vector<8x64xf32>
    %c0_9 = arith.constant 0 : index
    %c0_10 = arith.constant 0 : index
    %10 = vector.load %arg5[%c0_9, %c0_10] : memref<1x64xf32, #tpu.memory_space<vmem>>, vector<1x64xf32>
    %11 = vector.broadcast %10 : vector<1x64xf32> to vector<8x64xf32>
    %12 = arith.addf %9, %11 : vector<8x64xf32>
    %cst_11 = arith.constant 0.000000e+00 : f32
    %13 = vector.broadcast %cst_11 : f32 to vector<8x64xf32>
    %14 = arith.maximumf %12, %13 : vector<8x64xf32>
    %c0_12 = arith.constant 0 : index
    %c0_13 = arith.constant 0 : index
    %15 = vector.load %arg6[%c0_12, %c0_13] : memref<64x8xf32, #tpu.memory_space<vmem>>, vector<64x8xf32>
    %cst_14 = arith.constant dense<0.000000e+00> : vector<8x8xf32>
    %16 = tpu.matmul %14, %15, %cst_14 {dimension_numbers = #tpu.dot_dimension_numbers<[1], [0], [0], [1], [0, 0, 1, 1], [], []>} : vector<8x64xf32>, vector<64x8xf32>, vector<8x8xf32> -> vector<8x8xf32>
    %c0_15 = arith.constant 0 : index
    %c0_16 = arith.constant 0 : index
    %17 = vector.load %arg7[%c0_15, %c0_16] : memref<1x8xf32, #tpu.memory_space<vmem>>, vector<1x8xf32>
    %18 = vector.broadcast %17 : vector<1x8xf32> to vector<8x8xf32>
    %19 = arith.addf %16, %18 : vector<8x8xf32>
    %c0_17 = arith.constant 0 : index
    %c0_18 = arith.constant 0 : index
    %20 = vector.load %arg8[%c0_17, %c0_18] : memref<8x8xf32, #tpu.memory_space<vmem>>, vector<8x8xf32>
    tpu.vector_store %arg8[%c0_17, %c0_18], %19 {strides = array<i32>} : memref<8x8xf32, #tpu.memory_space<vmem>>, vector<8x8xf32>,
    return
  }
  func.func @transform_0(%arg0: i32) -> (i32, i32) {
    %c0_i32 = arith.constant 0 : i32
    %c0_i32_0 = arith.constant 0 : i32
    return %arg0, %c0_i32 : i32, i32
  }
  func.func @transform_1(%arg0: i32) -> (i32, i32) {
    %c0_i32 = arith.constant 0 : i32
    %c0_i32_0 = arith.constant 0 : i32
    %c0_i32_1 = arith.constant 0 : i32
    return %c0_i32, %c0_i32_0 : i32, i32
  }
  func.func @transform_2(%arg0: i32) -> (i32, i32) {
    %c0_i32 = arith.constant 0 : i32
    %c0_i32_0 = arith.constant 0 : i32
    %c0_i32_1 = arith.constant 0 : i32
    return %c0_i32, %c0_i32_0 : i32, i32
  }
  func.func @transform_3(%arg0: i32) -> (i32, i32) {
    %c0_i32 = arith.constant 0 : i32
    %c0_i32_0 = arith.constant 0 : i32
    %c0_i32_1 = arith.constant 0 : i32
    return %c0_i32, %c0_i32_0 : i32, i32
  }
  func.func @transform_4(%arg0: i32) -> (i32, i32) {
    %c0_i32 = arith.constant 0 : i32
    %c0_i32_0 = arith.constant 0 : i32
    %c0_i32_1 = arith.constant 0 : i32
    return %c0_i32, %c0_i32_0 : i32, i32
  }
  func.func @transform_5(%arg0: i32) -> (i32, i32) {
    %c0_i32 = arith.constant 0 : i32
    %c0_i32_0 = arith.constant 0 : i32
    %c0_i32_1 = arith.constant 0 : i32
    return %c0_i32, %c0_i32_0 : i32, i32
  }
  func.func @transform_6(%arg0: i32) -> (i32, i32) {
    %c0_i32 = arith.constant 0 : i32
    %c0_i32_0 = arith.constant 0 : i32
    %c0_i32_1 = arith.constant 0 : i32
    return %c0_i32, %c0_i32_0 : i32, i32
  }
  func.func @transform_7(%arg0: i32) -> (i32, i32) {
    %c0_i32 = arith.constant 0 : i32
    %c0_i32_0 = arith.constant 0 : i32
    return %arg0, %c0_i32 : i32, i32
  }
}

</mosaic_0001>

<bundles_post_ra>
// kernel: tpu_custom_call.1
= control target key start
LH: loop header
LB: loop body
LE: loop exit
PB: predicated region body
PF: predicated region fallthrough
CT: control target
= control target key end

     0   :  { %12 = vsyncpa [#allocation3], 0  ;;  %s606_s0 = inlined_call_operand.hbm [shape: f32[8,16], index: 0, kind: input, shape index: {}]   ;;  %s607_s1 = inlined_call_operand.vmem [shape: f32[16,64], index: 1, kind: input, shape index: {}]   ;;  %s608_s2 = inlined_call_operand.vmem [shape: f32[1,64], index: 2, kind: input, shape index: {}]   ;;  %s609_s3 = inlined_call_operand.vmem [shape: f32[64,64], index: 3, kind: input, shape index: {}]   ;;  %s610_s4 = inlined_call_operand.vmem [shape: f32[1,64], index: 4, kind: input, shape index: {}]   ;;  %s611_s5 = inlined_call_operand.vmem [shape: f32[64,8], index: 5, kind: input, shape index: {}]   ;;  %s612_s6 = inlined_call_operand.vmem [shape: f32[1,8], index: 6, kind: input, shape index: {}]   ;;  %s613_s7 = inlined_call_operand.hbm [shape: f32[8,8], index: 7, kind: output, shape index: {}]  }
   0x1   :  { %13 = vsyncpa [#allocation4], 0  ;;  %s471_s24 = smov [#allocation2]   ;;  %s423_s28 = scalar_lea.hbm %s606_s0, 128 }
   0x2   :  { %s20_s25 = sshll.u32 %s471_s24, 4  ;;  %p424_p0 = scmp.ne.s32.totalorder %s606_s0, %s423_s28  ;;  %s21_s25 = int_to_ptr.vmem [resolvable:$true] %s20_s25 }
   0x3   :  { %p427_p1 = scmp.lt.u32.totalorder %s423_s28, %s606_s0 }
   0x5   :  { %p429_p2 = pnand %p427_p1, %p424_p0 }
   0x7   :  { %432 = shalt.err (!%p429_p2)
}
   0x8   :  { %s433_s10 = scalar_lea.vmem %s21_s25, 128  ;;  %p438_p4 = scmp.lt.s32.totalorder %s21_s25, %s21_s25 }
   0x9   :  { %p434_p3 = scmp.ne.s32.totalorder %s21_s25, %s433_s10  ;;  %p439_p5 = scmp.lt.s32.totalorder %s433_s10, %s433_s10 }
   0xb   :  { %p440_p6 = por %p439_p5, %p438_p4 }
   0xd   :  { %p441_p7 = pnand %p440_p6, %p434_p3 }
   0xf   :  { %444 = shalt.err (!%p441_p7)
}
  0x10   :  { %23 = dma.hbm_to_vmem [thread:$0]  %s606_s0, 128, %s21_s25, [#allocation3]  }
  0x11   :  { %467 = dma.done.wait [#allocation3], 128  }
  0x12   :  { %468 = vsyncadd [#allocation3], 4294967168  ;;  %v472_v0 = vmov 0.0|0.0   ;;  %vm473_vm0 = vmmov 0   ;;  %v474_v1 = vmov 0.0   ;;  %v40_v2 = vld [vmem:[%s607_s1] sm:$0xff] }
  0x13   :  { %391 = vmatprep.subr.bf16.mxu0 %v472_v0  ;;  %350 = vmatprep.mubr.msk.f32.mxu0 %vm473_vm0, %v474_v1  ;;  %v41_v3 = vld [vmem:[%s607_s1 + $0x8] sm:$0xff]  ;;  %v124_v5 = vld [vmem:[%s609_s3] sm:$0xff]  ;;  %v126_v7 = vld [vmem:[%s609_s3 + $0x10] sm:$0xff]  ;;  %vm49_vm1 = vcmask 130048   ;;  %vm139_vm2 = vcmask 523264   ;;  %s475_s26 = smov [#allocation5]  }
  0x14   :  { %394 = vmatprep.subr.bf16.mxu1 %v472_v0  ;;  %369 = vmatprep.mubr.msk.f32.mxu1 %vm473_vm0, %v474_v1  ;;  %v392_v4 = vpack.c.bf16 %v41_v3, %v40_v2  ;;  %v125_v6 = vld [vmem:[%s609_s3 + $0x8] sm:$0xff]  ;;  %v127_v9 = vld [vmem:[%s609_s3 + $0x18] sm:$0xff]  ;;  %v39_v10 = vld [vmem:[#allocation2] sm:$0xff]  ;;  %s310_s27 = sshll.u32 %s475_s26, 4  ;;  %vm302_vm3 = vcmask 64512   ;;  %s311_s27 = int_to_ptr.vmem [resolvable:$true] %s310_s27 }
  0x15   :  { %v395_v8 = vpack.c.bf16 %v125_v6, %v124_v5  ;;  %v398_v11 = vpack.c.bf16 %v127_v9, %v126_v7  ;;  %v128_v12 = vld [vmem:[%s609_s3 + $0x20] sm:$0xff]  ;;  %v129_v13 = vld [vmem:[%s609_s3 + $0x28] sm:$0xff]  ;;  %v130_v15 = vld [vmem:[%s609_s3 + $0x30] sm:$0xff]  ;;  %p450_p9 = scmp.lt.s32.totalorder %s311_s27, %s311_s27 }
  0x16   :  { %393 = vmatpush3.bf16.msra.mxu0 %v392_v4  ;;  %v401_v14 = vpack.c.bf16 %v129_v13, %v128_v12  ;;  %v131_v16 = vld [vmem:[%s609_s3 + $0x38] sm:$0xff]  ;;  %v214_v18 = vld [vmem:[%s611_s5] sm:$0xff]  ;;  %v215_v19 = vld [vmem:[%s611_s5 + $0x8] sm:$0xff] }
  0x17   :  { %396 = vmatpush3.bf16.msra.mxu1 %v395_v8  ;;  %406 = vmatprep.subr.bf16.mxu0 %v472_v0  ;;  %v404_v17 = vpack.c.bf16 %v131_v16, %v130_v15  ;;  %v216_v20 = vld [vmem:[%s611_s5 + $0x10] sm:$0xff]  ;;  %v407_v21 = vpack.c.bf16 %v215_v19, %v214_v18  ;;  %v217_v22 = vld [vmem:[%s611_s5 + $0x18] sm:$0xff]  ;;  %v218_v24 = vld [vmem:[%s611_s5 + $0x20] sm:$0xff] }
  0x18   :  { %397 = vmatprep.subr.bf16.mxu1 %v472_v0  ;;  %v410_v23 = vpack.c.bf16 %v217_v22, %v216_v20  ;;  %v219_v25 = vld [vmem:[%s611_s5 + $0x28] sm:$0xff]  ;;  %v319_v27 = vld [vmem:[%s608_s2] ss:$0 sm:$0xff]  ;;  %v220_v32 = vld [vmem:[%s611_s5 + $0x30] sm:$0xff] }
  0x19   :  { %351 = vmatmul.mubr.msk.f32.vlgmr.msra.gmra.mrb[0].mxu0 %vm49_vm1, %v39_v10  ;;  %v413_v26 = vpack.c.bf16 %v219_v25, %v218_v24  ;;  %v221_v33 = vld [vmem:[%s611_s5 + $0x38] sm:$0xff]  ;;  %v321_v35 = vld [vmem:[%s610_s4] ss:$0 sm:$0xff]  ;;  %s445_s5 = scalar_lea.vmem %s311_s27, 128 }
  0x1a   :  { %388 = vmatprep.mubr.msk.f32.mxu0 %vm473_vm0, %v474_v1  ;;  %408 = vmatpush3.bf16.msra.mxu0 %v407_v21  ;;  %v416_v34 = vpack.c.bf16 %v221_v33, %v220_v32  ;;  %v323_v40 = vld [vmem:[%s612_s6] ss:$0 sm:$0xff]  ;;  %p446_p8 = scmp.ne.s32.totalorder %s311_s27, %s445_s5  ;;  %p451_p10 = scmp.lt.s32.totalorder %s445_s5, %s445_s5 }
  0x1b   :  { %399 = vmatpush3.bf16.msra.mxu1 %v398_v11  ;;  %409 = vmatprep.subr.bf16.mxu0 %v472_v0 }
  0x1c   :  { %400 = vmatprep.subr.bf16.mxu1 %v472_v0  ;;  %p452_p11 = por %p451_p10, %p450_p9 }
  0x1e   :  { %411 = vmatpush3.bf16.msra.mxu0 %v410_v23  ;;  %p453_p12 = pnand %p452_p11, %p446_p8 }
  0x1f   :  { %402 = vmatpush3.bf16.msra.mxu1 %v401_v14  ;;  %412 = vmatprep.subr.bf16.mxu0 %v472_v0 }
  0x20   :  { %403 = vmatprep.subr.bf16.mxu1 %v472_v0 }
  0x22   :  { %414 = vmatpush3.bf16.msra.mxu0 %v413_v26 }
  0x23   :  { %405 = vmatpush3.bf16.msra.mxu1 %v404_v17  ;;  %415 = vmatprep.subr.bf16.mxu0 %v472_v0 }
  0x26   :  { %417 = vmatpush3.bf16.msra.mxu0 %v416_v34 }
  0xec   :  { %v119_v28 = vpop.f32.mrb[0].mxu0 }
  0xed   :  { %v120_v29 = vadd.f32 %v319_v27, %v119_v28  ;;  %v352_v30 = vpop.f32.mrb[1].mxu0 }
  0xef   :  { %v123_v31 = vmax.f32 %v120_v29, 0.0 }
  0xf1   :  { %370 = vmatmul.mubr.msk.f32.vlgmr.msra.gmra.mrb[0].mxu1 %vm139_vm2, %v123_v31 }
 0x1c4   :  { %v209_v36 = vpop.f32.mrb[0].mxu1 }
 0x1c5   :  { %v210_v37 = vadd.f32 %v321_v35, %v209_v36  ;;  %v371_v38 = vpop.f32.mrb[1].mxu1 }
 0x1c7   :  { %v213_v39 = vmax.f32 %v210_v37, 0.0 }
 0x1c9   :  { %389 = vmatmul.mubr.msk.f32.vlgmr.msra.gmra.mrb[2].mxu0 %vm139_vm2, %v213_v39 }
 0x29c   :  { %v298_v41 = vpop.f32.mrb[2].mxu0 }
 0x29d   :  { %v299_v42 = vadd.f32 %v323_v40, %v298_v41  ;;  %v390_v43 = vpop.f32.mrb[3].mxu0 }
 0x29f   :  { %303 = vst.msk [vmem:[#allocation5] sm:$0xff] %vm302_vm3, %v299_v42 }
 0x2a0   :  { %456 = shalt.err (!%p453_p12)
}
 0x2a1   :  { %s457_s29 = scalar_lea.hbm %s613_s7, 128 }
 0x2a2   :  { %p458_p13 = scmp.ne.s32.totalorder %s613_s7, %s457_s29  ;;  %p461_p0 = scmp.lt.u32.totalorder %s457_s29, %s613_s7 }
 0x2a4   :  { %p463_p1 = pnand %p461_p0, %p458_p13 }
 0x2a6   :  { %466 = shalt.err (!%p463_p1)
}
 0x2a7   :  { %313 = dma.vmem_to_hbm [thread:$0]  %s311_s27, 128, %s613_s7, [#allocation4]  }
 0x2a8   :  { %469 = dma.done.wait [#allocation4], 128  }
 0x2a9   :  { %470 = vsyncadd [#allocation4], 4294967168 }
 0x2aa   :  { %317 = vsyncpa [#allocation3], 1 }
 0x2ab   :  { %318 = vsyncpa [#allocation4], 1 }

</bundles_post_ra>
